<compile_context>
chip_gen: v7x
topology: tpu7x:2x2x1
jax: 0.10.0
libtpu: 0.0.40
codegen_flags: <defaults>
</compile_context>

<pallas_src>
import jax
import jax.numpy as jnp
from jax.experimental import pallas as pl
from jax.experimental.pallas import tpu as pltpu


def _hbm_copy_kernel(x_ref, o_ref, sem):
    # Single whole-array HBM->HBM DMA: materializes the view with no VMEM relay.
    cp = pltpu.make_async_copy(x_ref, o_ref, sem)
    cp.start()
    cp.wait()


def _materialize_copy(x2d: jax.Array) -> jax.Array:
    """Identity copy of a 2-D array via one direct HBM->HBM DMA."""
    rows, cols = x2d.shape
    total_bytes = rows * cols * jnp.dtype(x2d.dtype).itemsize

    return pl.pallas_call(
        _hbm_copy_kernel,
        out_shape=jax.ShapeDtypeStruct((rows, cols), x2d.dtype),
        in_specs=[pl.BlockSpec(memory_space=pl.ANY)],
        out_specs=pl.BlockSpec(memory_space=pl.ANY),
        scratch_shapes=[pltpu.SemaphoreType.DMA(())],
        cost_estimate=pl.CostEstimate(
            flops=0, transcendentals=0, bytes_accessed=2 * total_bytes
        ),
    )(x2d)


def pallas_view(x: jax.Array, shape: int) -> jax.Array:
    """Equivalent of torch `input.view(-1, shape)`; copy materialized in Pallas."""
    total = x.size
    assert total % shape == 0, f"numel {total} not divisible by shape {shape}"
    rows = total // shape

    # Reshape is free (metadata); the Pallas kernel performs the identity copy
    # directly in HBM.  Works for any rows/shape (no tiling constraints).
    x2d = jnp.reshape(x, (rows, shape))
    return _materialize_copy(x2d)


if __name__ == "__main__":
    # x is NCHW (2, 4, 16, 16); View(shape=32) -> (2*4*16*16 // 32, 32) = (64, 32).
    key = jax.random.PRNGKey(0)
    x = jax.random.normal(key, (2, 4, 16, 16), dtype=jnp.float32)
    view_shape = 32

    y = jax.block_until_ready(pallas_view(x, view_shape))

    # Correctness against the pure-JAX reference (== torch .view(-1, 32)).
    ref = jnp.reshape(x, (-1, view_shape))
    assert y.shape == (64, 32), y.shape
    assert y.dtype == x.dtype
    assert bool(jnp.array_equal(y, ref))

    print("KERNEL_OK")
</pallas_src>

<mosaic_0001>
module attributes {stable_mosaic.version = 11 : i64} {
  func.func @_hbm_copy_kernel(%arg0: memref<64x32xf32, #tpu.memory_space<any>>, %arg1: memref<64x32xf32, #tpu.memory_space<any>>, %arg2: memref<!tpu.dma_semaphore, #tpu.memory_space<semaphore_mem>>) attributes {dimension_semantics = [], scalar_prefetch = 0 : i64, scratch_operands = 1 : i64, tpu.core_type = #tpu.core_type<tc>} {
    tpu.enqueue_dma source(%arg0 : memref<64x32xf32, #tpu.memory_space<any>>) target(%arg1 : memref<64x32xf32, #tpu.memory_space<any>>) target_semaphore(%arg2 : memref<!tpu.dma_semaphore, #tpu.memory_space<semaphore_mem>>)
    tpu.wait_dma2 semaphore(%arg2 : memref<!tpu.dma_semaphore, #tpu.memory_space<semaphore_mem>>) src(%arg0 : memref<64x32xf32, #tpu.memory_space<any>>) dst(%arg1 : memref<64x32xf32, #tpu.memory_space<any>>)
    return
  }
}

</mosaic_0001>

<bundles_post_ra>
// kernel: tpu_custom_call.1
= control target key start
LH: loop header
LB: loop body
LE: loop exit
PB: predicated region body
PF: predicated region fallthrough
CT: control target
= control target key end

     0   :  { %s140_s0 = inlined_call_operand.vmem [shape: f32[64,32], index: 0, kind: input, shape index: {}]   ;;  %s141_s1 = inlined_call_operand.vmem [shape: f32[64,32], index: 1, kind: output, shape index: {}]  }
   0x1   :  { %v38_v0 = vld [vmem:[%s140_s0] sm:$0xff]  ;;  %v40_v1 = vld [vmem:[%s140_s0 + $0x8] sm:$0xff]  ;;  %v42_v2 = vld [vmem:[%s140_s0 + $0x10] sm:$0xff] }
   0x2   :  { %39 = vst [vmem:[%s141_s1] sm:$0xff] %v38_v0  ;;  %41 = vst [vmem:[%s141_s1 + $0x8] sm:$0xff] %v40_v1  ;;  %v44_v3 = vld [vmem:[%s140_s0 + $0x18] sm:$0xff]  ;;  %v46_v4 = vld [vmem:[%s140_s0 + $0x20] sm:$0xff] }
   0x3   :  { %43 = vst [vmem:[%s141_s1 + $0x10] sm:$0xff] %v42_v2  ;;  %v48_v5 = vld [vmem:[%s140_s0 + $0x28] sm:$0xff]  ;;  %45 = vst [vmem:[%s141_s1 + $0x18] sm:$0xff] %v44_v3  ;;  %v50_v6 = vld [vmem:[%s140_s0 + $0x30] sm:$0xff] }
   0x4   :  { %47 = vst [vmem:[%s141_s1 + $0x20] sm:$0xff] %v46_v4  ;;  %49 = vst [vmem:[%s141_s1 + $0x28] sm:$0xff] %v48_v5  ;;  %v52_v7 = vld [vmem:[%s140_s0 + $0x38] sm:$0xff] }
   0x5   :  { %51 = vst [vmem:[%s141_s1 + $0x30] sm:$0xff] %v50_v6  ;;  %53 = vst [vmem:[%s141_s1 + $0x38] sm:$0xff] %v52_v7 }
   0x6   :  { %61 = vsyncadd [#allocation2], 1024 }
   0x7   :  { %80 = dma.done.wait [#allocation2], 1024 }
   0x8   :  { %81 = vsyncadd [#allocation2], 4294966272 }
   0x9   :  { %65 = vsyncmov [#allocation2] }
   0xc   :  { %s66_s9 = vpop.sfrf %65 }
   0xd   :  { %p79_p0 = scmp.ne.s32.totalorder %s66_s9, 0 }
   0xf   :  { %70 = shalt.err (%p79_p0)  }

</bundles_post_ra>
